<compile_context>
chip_gen: v6e
topology: v6e:2x2x1
jax: 0.10.0
libtpu: 0.0.40
codegen_flags: <defaults>
</compile_context>

<pallas_src>
import functools

import jax
import jax.numpy as jnp
from jax import lax
from jax.experimental import pallas as pl
from jax.experimental.pallas import tpu as pltpu


# ---------------------------------------------------------------------------
# Pallas kernels
# ---------------------------------------------------------------------------
def _mm_bn_act_kernel(x_ref, w_ref, scale_ref, bias_ref, o_ref, *, relu):
    # bf16 operands -> MXU, f32 accumulate; BN fold + optional ReLU in f32.
    acc = jnp.dot(x_ref[...], w_ref[...], preferred_element_type=jnp.float32)
    acc = acc * scale_ref[...] + bias_ref[...]
    if relu:
        acc = jnp.maximum(acc, 0.0)
    o_ref[...] = acc.astype(o_ref.dtype)


def _mm_bn_add_relu_kernel(x_ref, w_ref, scale_ref, bias_ref, res_ref, o_ref):
    # Second conv of a ResBlock: matmul + BN + residual add + ReLU, fused.
    acc = jnp.dot(x_ref[...], w_ref[...], preferred_element_type=jnp.float32)
    acc = acc * scale_ref[...] + bias_ref[...]
    acc = acc + res_ref[...].astype(jnp.float32)
    acc = jnp.maximum(acc, 0.0)
    o_ref[...] = acc.astype(o_ref.dtype)


def _head_kernel(x_ref, w_ref, b_ref, o_ref):
    # x_ref: (B, C, S) f32 feature map with spatial on the lane axis.
    pooled = jnp.mean(x_ref[...], axis=-1)                      # (B, C) f32
    y = jnp.dot(pooled.astype(jnp.bfloat16), w_ref[...],
                preferred_element_type=jnp.float32)             # (B, 128)
    o_ref[...] = y + b_ref[...]


# ---------------------------------------------------------------------------
# Kernel wrappers
# ---------------------------------------------------------------------------
def fused_matmul_bn(x2d, w, scale, bias, *, residual=None, relu=False,
                    tile_m=128):
    """out = (x @ w) * scale + bias [+ residual] [ReLU]; bf16 MXU, f32 accum."""
    M, K = x2d.shape
    N = w.shape[1]
    TM = tile_m if (M % tile_m == 0) else M     # rows tile (multiple of 8/16)
    grid = (M // TM,)

    x_bf = x2d.astype(jnp.bfloat16)
    w_bf = w.astype(jnp.bfloat16)
    scale2 = scale.reshape(1, N).astype(jnp.float32)
    bias2 = bias.reshape(1, N).astype(jnp.float32)

    in_specs = [
        pl.BlockSpec((TM, K), lambda i: (i, 0)),   # activation rows stream
        pl.BlockSpec((K, N), lambda i: (0, 0)),    # weights stay resident
        pl.BlockSpec((1, N), lambda i: (0, 0)),    # folded BN scale
        pl.BlockSpec((1, N), lambda i: (0, 0)),    # folded BN bias
    ]
    args = [x_bf, w_bf, scale2, bias2]

    if residual is None:
        kernel = functools.partial(_mm_bn_act_kernel, relu=relu)
    else:
        kernel = _mm_bn_add_relu_kernel
        in_specs.append(pl.BlockSpec((TM, N), lambda i: (i, 0)))
        args.append(residual.astype(jnp.float32))

    return pl.pallas_call(
        kernel,
        out_shape=jax.ShapeDtypeStruct((M, N), jnp.float32),
        grid=grid,
        in_specs=in_specs,
        out_specs=pl.BlockSpec((TM, N), lambda i: (i, 0)),
        compiler_params=pltpu.CompilerParams(
            dimension_semantics=("parallel",)),
    )(*args)


def head_pallas(h_nhwc, w_head, b_head):
    """Global average pool + linear head, lane-dense (padded to 128) output."""
    B, H, W, C = h_nhwc.shape
    nc = w_head.shape[1]
    NP = 128
    w_pad = jnp.zeros((C, NP), jnp.float32).at[:, :nc].set(w_head)
    b_pad = jnp.zeros((1, NP), jnp.float32).at[:, :nc].set(b_head)
    x_bcs = jnp.transpose(h_nhwc, (0, 3, 1, 2)).reshape(B, C, H * W)

    vmem = pl.BlockSpec(memory_space=pltpu.MemorySpace.VMEM)
    logits_pad = pl.pallas_call(
        _head_kernel,
        out_shape=jax.ShapeDtypeStruct((B, NP), jnp.float32),
        in_specs=[vmem, vmem, vmem],
        out_specs=vmem,
    )(x_bcs.astype(jnp.float32), w_pad.astype(jnp.bfloat16), b_pad)
    return logits_pad[:, :nc]


# ---------------------------------------------------------------------------
# JAX glue: layout plumbing (im2col, BN folding) and the full forward pass
# ---------------------------------------------------------------------------
def _fold_bn(gamma, beta, mean, var, eps=1e-5):
    scale = gamma / jnp.sqrt(var + eps)
    bias = beta - mean * scale
    return scale.astype(jnp.float32), bias.astype(jnp.float32)


def _im2col_3x3(x_nhwc, stride):
    """3x3 / pad 1 / stride s patches -> (B*Ho*Wo, 9*C), row order (b, y, x)."""
    B, H, W, C = x_nhwc.shape
    xp = jnp.pad(x_nhwc, ((0, 0), (1, 1), (1, 1), (0, 0)))
    Ho = (H + 2 - 3) // stride + 1
    Wo = (W + 2 - 3) // stride + 1
    cols = []
    for ky in range(3):
        for kx in range(3):
            cols.append(xp[:, ky:ky + (Ho - 1) * stride + 1:stride,
                           kx:kx + (Wo - 1) * stride + 1:stride, :])
    patches = jnp.concatenate(cols, axis=-1)          # (B, Ho, Wo, 9*C)
    return patches.reshape(B * Ho * Wo, 9 * C), (Ho, Wo)


def resnet_forward_pallas(x_nchw, params):
    x = jnp.transpose(x_nchw, (0, 2, 3, 1)).astype(jnp.float32)   # NHWC
    B, H, W, _ = x.shape

    # expand: 1x1 conv + BN (no ReLU)
    p = params['expand']
    C = p['w'].shape[1]
    h = fused_matmul_bn(x.reshape(B * H * W, -1), p['w'], p['scale'], p['bias'])
    h = h.reshape(B, H, W, C)

    # residual blocks
    for bp in params['blocks']:
        s = bp['stride']
        cin = h.shape[-1]
        cout = bp['w2'].shape[1]

        # conv1: 3x3 stride s + BN + ReLU (im2col in glue, matmul in kernel)
        patches, (Ho, Wo) = _im2col_3x3(h, s)
        w1_mat = bp['w1_hwio'].reshape(9 * cin, cout)
        t = fused_matmul_bn(patches, w1_mat, bp['scale1'], bp['bias1'],
                            relu=True)

        # skip path
        if bp['skip'] is None:
            skip = h.reshape(B * Ho * Wo, cin)
        else:
            hs = h[:, ::s, ::s, :].reshape(B * Ho * Wo, cin)
            skip = fused_matmul_bn(hs, bp['skip']['w'], bp['skip']['scale'],
                                   bp['skip']['bias'])

        # conv2: 1x1 + BN, fused residual add + ReLU
        h = fused_matmul_bn(t, bp['w2'], bp['scale2'], bp['bias2'],
                            residual=skip, relu=True)
        h = h.reshape(B, Ho, Wo, cout)
        H, W = Ho, Wo

    # head: global average pool + linear
    hp = params['head']
    return head_pallas(h, hp['w'], hp['b'])


# ---------------------------------------------------------------------------
# Pure-JAX reference (independent lax.conv path; bf16 operands, f32 accum)
# ---------------------------------------------------------------------------
def resnet_forward_reference(x_nchw, params):
    x = jnp.transpose(x_nchw, (0, 2, 3, 1)).astype(jnp.float32)

    def conv(inp, w_hwio, stride, padding):
        return lax.conv_general_dilated(
            inp.astype(jnp.bfloat16), w_hwio.astype(jnp.bfloat16),
            window_strides=(stride, stride), padding=padding,
            dimension_numbers=("NHWC", "HWIO", "NHWC"),
            preferred_element_type=jnp.float32)

    p = params['expand']
    w = p['w']
    h = conv(x, w.reshape(1, 1, *w.shape), 1, "VALID") * p['scale'] + p['bias']
    for bp in params['blocks']:
        s = bp['stride']
        t = conv(h, bp['w1_hwio'], s, [(1, 1), (1, 1)]) * bp['scale1'] + bp['bias1']
        t = jnp.maximum(t, 0.0)
        w2 = bp['w2']
        t = conv(t, w2.reshape(1, 1, *w2.shape), 1, "VALID") * bp['scale2'] + bp['bias2']
        if bp['skip'] is None:
            sk = h
        else:
            wsk = bp['skip']['w']
            sk = (conv(h, wsk.reshape(1, 1, *wsk.shape), s, "VALID")
                  * bp['skip']['scale'] + bp['skip']['bias'])
        h = jnp.maximum(t + sk, 0.0)
    pooled = jnp.mean(h, axis=(1, 2))
    hp = params['head']
    return jnp.dot(pooled.astype(jnp.bfloat16), hp['w'].astype(jnp.bfloat16),
                   preferred_element_type=jnp.float32) + hp['b']


# ---------------------------------------------------------------------------
# Synthetic parameters matching the ResNet constructor (headless=False)
# ---------------------------------------------------------------------------
def init_params(key, in_channels, block_features, num_classes):
    bf = [block_features[0]] + list(block_features)
    keys = iter(jax.random.split(key, 64))

    def bn(c):
        g = 1.0 + 0.1 * jax.random.normal(next(keys), (c,), jnp.float32)
        b = 0.1 * jax.random.normal(next(keys), (c,), jnp.float32)
        m = 0.1 * jax.random.normal(next(keys), (c,), jnp.float32)
        v = jnp.abs(1.0 + 0.1 * jax.random.normal(next(keys), (c,), jnp.float32))
        return _fold_bn(g, b, m, v)

    def w1x1(cin, cout):
        return jax.random.normal(next(keys), (cin, cout), jnp.float32) / (cin ** 0.5)

    def w3x3(cin, cout):
        return jax.random.normal(next(keys), (3, 3, cin, cout), jnp.float32) / ((9 * cin) ** 0.5)

    s, b = bn(bf[0])
    params = {'expand': dict(w=w1x1(in_channels, bf[0]), scale=s, bias=b)}

    blocks = []
    for i in range(len(bf) - 1):
        cin, cout = bf[i], bf[i + 1]
        stride = 1 if cin >= cout else 2
        s1, b1 = bn(cout)
        s2, b2 = bn(cout)
        blk = dict(stride=stride,
                   w1_hwio=w3x3(cin, cout), scale1=s1, bias1=b1,
                   w2=w1x1(cout, cout), scale2=s2, bias2=b2)
        if stride == 1 and cin == cout:
            blk['skip'] = None
        else:
            ss, sb = bn(cout)
            blk['skip'] = dict(w=w1x1(cin, cout), scale=ss, bias=sb)
        blocks.append(blk)
    params['blocks'] = blocks

    params['head'] = dict(
        w=jax.random.normal(next(keys), (bf[-1], num_classes), jnp.float32) / (bf[-1] ** 0.5),
        b=0.1 * jax.random.normal(next(keys), (num_classes,), jnp.float32))
    return params


# ---------------------------------------------------------------------------
if __name__ == "__main__":
    B, Cin, Hs, Ws = 2, 4, 16, 16
    block_features = [32, 64]          # -> blocks: (32->32, s1), (32->64, s2)
    num_classes = 10

    key = jax.random.PRNGKey(0)
    kx, kp = jax.random.split(key)
    x = jax.random.normal(kx, (B, Cin, Hs, Ws), dtype=jnp.float32)
    params = init_params(kp, Cin, block_features, num_classes)

    logits = resnet_forward_pallas(x, params)
    logits = jax.block_until_ready(logits)

    ref = resnet_forward_reference(x, params)
    assert logits.shape == (B, num_classes)
    assert bool(jnp.all(jnp.isfinite(logits)))
    assert jnp.allclose(logits, ref, atol=1e-2, rtol=1e-2), (logits, ref)

    print("KERNEL_OK")
</pallas_src>

<mosaic_0001>
module attributes {stable_mosaic.version = 11 : i64} {
  func.func @_mm_bn_act_kernel(%arg0: i32, %arg1: memref<128x4xbf16, #tpu.memory_space<vmem>>, %arg2: memref<4x32xbf16, #tpu.memory_space<vmem>>, %arg3: memref<1x32xf32, #tpu.memory_space<vmem>>, %arg4: memref<1x32xf32, #tpu.memory_space<vmem>>, %arg5: memref<128x32xf32, #tpu.memory_space<vmem>>) attributes {dimension_semantics = [#tpu.dimension_semantics<parallel>], iteration_bounds = array<i64: 4>, scalar_prefetch = 0 : i64, scratch_operands = 0 : i64, tpu.core_type = #tpu.core_type<tc>, window_params = [{transform_indices = @transform_0, window_bounds = array<i64: 128, 4>}, {pipeline_mode = #tpu.pipeline_mode<synchronous>, transform_indices = @transform_1, window_bounds = array<i64: 4, 32>}, {pipeline_mode = #tpu.pipeline_mode<synchronous>, transform_indices = @transform_2, window_bounds = array<i64: 1, 32>}, {pipeline_mode = #tpu.pipeline_mode<synchronous>, transform_indices = @transform_3, window_bounds = array<i64: 1, 32>}, {transform_indices = @transform_4, window_bounds = array<i64: 128, 32>}]} {
    %c0 = arith.constant 0 : index
    %c0_0 = arith.constant 0 : index
    %0 = vector.load %arg1[%c0, %c0_0] : memref<128x4xbf16, #tpu.memory_space<vmem>>, vector<128x4xbf16>
    %c0_1 = arith.constant 0 : index
    %c0_2 = arith.constant 0 : index
    %1 = vector.load %arg2[%c0_1, %c0_2] : memref<4x32xbf16, #tpu.memory_space<vmem>>, vector<4x32xbf16>
    %cst = arith.constant dense<0.000000e+00> : vector<128x32xf32>
    %2 = tpu.matmul %0, %1, %cst {dimension_numbers = #tpu.dot_dimension_numbers<[1], [0], [0], [1], [0, 0, 1, 1], [], []>} : vector<128x4xbf16>, vector<4x32xbf16>, vector<128x32xf32> -> vector<128x32xf32>
    %c0_3 = arith.constant 0 : index
    %c0_4 = arith.constant 0 : index
    %3 = vector.load %arg3[%c0_3, %c0_4] : memref<1x32xf32, #tpu.memory_space<vmem>>, vector<1x32xf32>
    %4 = vector.broadcast %3 : vector<1x32xf32> to vector<128x32xf32>
    %5 = arith.mulf %2, %4 : vector<128x32xf32>
    %c0_5 = arith.constant 0 : index
    %c0_6 = arith.constant 0 : index
    %6 = vector.load %arg4[%c0_5, %c0_6] : memref<1x32xf32, #tpu.memory_space<vmem>>, vector<1x32xf32>
    %7 = vector.broadcast %6 : vector<1x32xf32> to vector<128x32xf32>
    %8 = arith.addf %5, %7 : vector<128x32xf32>
    %c0_7 = arith.constant 0 : index
    %c0_8 = arith.constant 0 : index
    %9 = vector.load %arg5[%c0_7, %c0_8] : memref<128x32xf32, #tpu.memory_space<vmem>>, vector<128x32xf32>
    tpu.vector_store %arg5[%c0_7, %c0_8], %8 {strides = array<i32>} : memref<128x32xf32, #tpu.memory_space<vmem>>, vector<128x32xf32>,
    return
  }
  func.func @transform_0(%arg0: i32) -> (i32, i32) {
    %c0_i32 = arith.constant 0 : i32
    %c0_i32_0 = arith.constant 0 : i32
    return %arg0, %c0_i32 : i32, i32
  }
  func.func @transform_1(%arg0: i32) -> (i32, i32) {
    %c0_i32 = arith.constant 0 : i32
    %c0_i32_0 = arith.constant 0 : i32
    %c0_i32_1 = arith.constant 0 : i32
    return %c0_i32, %c0_i32_0 : i32, i32
  }
  func.func @transform_2(%arg0: i32) -> (i32, i32) {
    %c0_i32 = arith.constant 0 : i32
    %c0_i32_0 = arith.constant 0 : i32
    %c0_i32_1 = arith.constant 0 : i32
    return %c0_i32, %c0_i32_0 : i32, i32
  }
  func.func @transform_3(%arg0: i32) -> (i32, i32) {
    %c0_i32 = arith.constant 0 : i32
    %c0_i32_0 = arith.constant 0 : i32
    %c0_i32_1 = arith.constant 0 : i32
    return %c0_i32, %c0_i32_0 : i32, i32
  }
  func.func @transform_4(%arg0: i32) -> (i32, i32) {
    %c0_i32 = arith.constant 0 : i32
    %c0_i32_0 = arith.constant 0 : i32
    return %arg0, %c0_i32 : i32, i32
  }
}

</mosaic_0001>

<bundles_post_ra>
// kernel: tpu_custom_call.1
= control target key start
LH: loop header
LB: loop body
LE: loop exit
PB: predicated region body
PF: predicated region fallthrough
CT: control target
= control target key end

     0   :  { %s613_s15 = smov 0   ;;  %s699_s0 = inlined_call_operand.vmem [shape: bf16[512,4], index: 0, kind: input, shape index: {}]   ;;  %s700_s1 = inlined_call_operand.vmem [shape: bf16[4,32], index: 1, kind: input, shape index: {}]   ;;  %s701_s2 = inlined_call_operand.vmem [shape: f32[1,32], index: 2, kind: input, shape index: {}]   ;;  %s702_s3 = inlined_call_operand.vmem [shape: f32[1,32], index: 3, kind: input, shape index: {}]   ;;  %s703_s4 = inlined_call_operand.vmem [shape: f32[512,32], index: 4, kind: output, shape index: {}]  }
   0x1 LB: > { %s504_s16 = sadd.s32 4294967295, %s586_s15   ;;  %p508_p0 = scmp.ge.s32.totalorder %s586_s15, 1  ;;  %s586_s15 = sphi %s613_s15, %s14_s15  }
   0x2   : > { %p163_p1 = scmp.lt.s32.totalorder %s586_s15, 5 }
   0x4   : > { %p164_p2 = pnand %p508_p0, %p163_p1 }
   0x5   : > { %s509_s19 = sshll.u32 (!%p164_p2), %s504_s16, 4 }
   0x6   : > { %167 = sbr.rel (%p164_p2) target bundleno = 229 (0xe5), region = 36  ;;  %p190_p3 = scmp.lt.s32.totalorder (!%p164_p2), %s509_s19, 63 }
   0xb   : > { %v218_v0 = vld [vmem:[%s700_s1] sm:$0x3]  ;;  %vm284_vm0 = vcmask 1041408   ;;  %s705_s19 = smov (!%p190_p3, %s509_s19), 63  ;;  %vm259_vm1 = vcmask 31744   ;;  %vm431_vm2 = vcmask 261120  }
   0xc   : > { %562 = vmatprep.subr.msk.bf16.mxu0 %vm284_vm0, %v218_v0  ;;  %563 = vmatprep.subr.msk.bf16.mxu1 %vm284_vm0, %v218_v0  ;;  %v286_v1 = vsel %vm284_vm0, %v218_v0, 0  ;;  %s510_s20 = sshll.u32 %s705_s19, 2  ;;  %v529_v10 = vld [vmem:[%s701_s2] ss:$0 sm:$0xff]  ;;  %s512_s26 = sshll.u32 %s705_s19, 3 }
   0xd   : > { %543 = vmatpush3.bf16.msra.mxu0 %v286_v1  ;;  %561 = vmatpush3.bf16.msra.mxu1 %v286_v1  ;;  %s193_s23 = scalar_lea.vmem %s699_s0, %s510_s20  ;;  %v641_v12 = vld [vmem:[%s702_s3] ss:$0 sm:$0xff]  ;;  %s646_s5 = scalar_lea.vmem %s703_s4, %s512_s26 }
   0xe   : > { %v572_v2 = vld [vmem:[%s193_s23] sm:$0xff]   ;;  %v574_v4 = vld [vmem:[%s193_s23 + $0x8] sm:$0xff]   ;;  %v576_v6 = vld [vmem:[%s193_s23 + $0x10] sm:$0xff]  }
   0xf   : > { %v573_v3 = vld [vmem:[%s193_s23 + $0x20] sm:$0xff]   ;;  %544 = vmatprep.mubr.msk.bf16.mxu0 %vm259_vm1, %v572_v2  ;;  %v575_v5 = vld [vmem:[%s193_s23 + $0x28] sm:$0xff]   ;;  %v577_v7 = vld [vmem:[%s193_s23 + $0x30] sm:$0xff]  }
  0x10   : > { %552 = vmatprep.mubr.msk.bf16.mxu1 %vm259_vm1, %v573_v3  ;;  %545 = vmatmul.mubr.msk.bf16.vlgmr.msra.gmra.mxu0 %vm259_vm1, %v574_v4  ;;  %v578_v8 = vld [vmem:[%s193_s23 + $0x18] sm:$0xff]  }
  0x11   : > { %553 = vmatmul.mubr.msk.bf16.vlgmr.msra.gmra.mxu1 %vm259_vm1, %v575_v5  ;;  %548 = vmatprep.mubr.msk.bf16.mxu0 %vm259_vm1, %v576_v6  ;;  %v579_v9 = vld [vmem:[%s193_s23 + $0x38] sm:$0xff]  }
  0x12   : > { %556 = vmatprep.mubr.msk.bf16.mxu1 %vm259_vm1, %v577_v7 }
  0x18   : > { %549 = vmatmul.mubr.msk.bf16.gmra.mxu0 %vm259_vm1, %v578_v8 }
  0x19   : > { %557 = vmatmul.mubr.msk.bf16.gmra.mxu1 %vm259_vm1, %v579_v9 }
  0xd0   : > { %v546_v11 = vpop.f32.mrf.mxu0 }
  0xd1   : > { %v394_v13 = vmul.f32 %v546_v11, %v529_v10  ;;  %v554_v14 = vpop.f32.mrf.mxu1 }
  0xd2   : > { %v402_v15 = vmul.f32 %v554_v14, %v529_v10  ;;  %v322_v16 = vpop.f32.mrf.mxu0 }
  0xd3   : > { %v417_v17 = vadd.f32 %v641_v12, %v394_v13  ;;  %v392_v18 = vmul.f32 %v529_v10, %v322_v16  ;;  %v354_v19 = vpop.f32.mrf.mxu1 }
  0xd4   : > { %v425_v20 = vadd.f32 %v641_v12, %v402_v15  ;;  %v400_v21 = vmul.f32 %v529_v10, %v354_v19  ;;  %v547_v22 = vpop.f32.mrf.mxu0 }
  0xd5   : > { %434 = vst.msk [vmem:[%s646_s5 + $0x10] sm:$0xff] %vm431_vm2, %v417_v17  ;;  %v415_v23 = vadd.f32 %v641_v12, %v392_v18  ;;  %v395_v24 = vmul.f32 %v547_v22, %v529_v10  ;;  %v555_v25 = vpop.f32.mrf.mxu1 }
  0xd6   : > { %442 = vst.msk [vmem:[%s646_s5 + $0x50] sm:$0xff] %vm431_vm2, %v425_v20  ;;  %v423_v26 = vadd.f32 %v641_v12, %v400_v21  ;;  %v403_v27 = vmul.f32 %v555_v25, %v529_v10  ;;  %v325_v28 = vpop.f32.mrf.mxu0 }
  0xd7   : > { %432 = vst.msk [vmem:[%s646_s5] sm:$0xff] %vm431_vm2, %v415_v23  ;;  %v418_v29 = vadd.f32 %v641_v12, %v395_v24  ;;  %v393_v30 = vmul.f32 %v529_v10, %v325_v28  ;;  %v357_v31 = vpop.f32.mrf.mxu1 }
  0xd8   : > { %440 = vst.msk [vmem:[%s646_s5 + $0x40] sm:$0xff] %vm431_vm2, %v423_v26  ;;  %v426_v32 = vadd.f32 %v641_v12, %v403_v27  ;;  %v401_v33 = vmul.f32 %v529_v10, %v357_v31  ;;  %v550_v34 = vpop.f32.mrf.mxu0 }
  0xd9   : > { %435 = vst.msk [vmem:[%s646_s5 + $0x18] sm:$0xff] %vm431_vm2, %v418_v29  ;;  %v416_v35 = vadd.f32 %v641_v12, %v393_v30  ;;  %v398_v36 = vmul.f32 %v550_v34, %v529_v10  ;;  %v558_v37 = vpop.f32.mrf.mxu1 }
  0xda   : > { %443 = vst.msk [vmem:[%s646_s5 + $0x58] sm:$0xff] %vm431_vm2, %v426_v32  ;;  %v424_v38 = vadd.f32 %v641_v12, %v401_v33  ;;  %v406_v39 = vmul.f32 %v558_v37, %v529_v10  ;;  %v338_v40 = vpop.f32.mrf.mxu0 }
  0xdb   : > { %433 = vst.msk [vmem:[%s646_s5 + $0x8] sm:$0xff] %vm431_vm2, %v416_v35  ;;  %v421_v41 = vadd.f32 %v641_v12, %v398_v36  ;;  %v396_v42 = vmul.f32 %v529_v10, %v338_v40  ;;  %v370_v43 = vpop.f32.mrf.mxu1 }
  0xdc   : > { %441 = vst.msk [vmem:[%s646_s5 + $0x48] sm:$0xff] %vm431_vm2, %v424_v38  ;;  %v429_v44 = vadd.f32 %v641_v12, %v406_v39  ;;  %v404_v45 = vmul.f32 %v529_v10, %v370_v43  ;;  %v551_v46 = vpop.f32.mrf.mxu0 }
  0xdd   : > { %438 = vst.msk [vmem:[%s646_s5 + $0x30] sm:$0xff] %vm431_vm2, %v421_v41  ;;  %v419_v47 = vadd.f32 %v641_v12, %v396_v42  ;;  %v399_v48 = vmul.f32 %v551_v46, %v529_v10  ;;  %v559_v49 = vpop.f32.mrf.mxu1 }
  0xde   : > { %446 = vst.msk [vmem:[%s646_s5 + $0x70] sm:$0xff] %vm431_vm2, %v429_v44  ;;  %v427_v50 = vadd.f32 %v641_v12, %v404_v45  ;;  %v407_v51 = vmul.f32 %v559_v49, %v529_v10  ;;  %v341_v52 = vpop.f32.mrf.mxu0 }
  0xdf   : > { %436 = vst.msk [vmem:[%s646_s5 + $0x20] sm:$0xff] %vm431_vm2, %v419_v47  ;;  %v422_v53 = vadd.f32 %v641_v12, %v399_v48  ;;  %v397_v54 = vmul.f32 %v529_v10, %v341_v52  ;;  %v373_v55 = vpop.f32.mrf.mxu1 }
  0xe0   : > { %444 = vst.msk [vmem:[%s646_s5 + $0x60] sm:$0xff] %vm431_vm2, %v427_v50  ;;  %v430_v56 = vadd.f32 %v641_v12, %v407_v51  ;;  %v405_v57 = vmul.f32 %v529_v10, %v373_v55 }
  0xe1   : > { %439 = vst.msk [vmem:[%s646_s5 + $0x38] sm:$0xff] %vm431_vm2, %v422_v53  ;;  %v420_v58 = vadd.f32 %v641_v12, %v397_v54 }
  0xe2   : > { %447 = vst.msk [vmem:[%s646_s5 + $0x78] sm:$0xff] %vm431_vm2, %v430_v56  ;;  %v428_v59 = vadd.f32 %v641_v12, %v405_v57 }
  0xe3   : > { %437 = vst.msk [vmem:[%s646_s5 + $0x28] sm:$0xff] %vm431_vm2, %v420_v58 }
  0xe4   : > { %445 = vst.msk [vmem:[%s646_s5 + $0x68] sm:$0xff] %vm431_vm2, %v428_v59 }
  0xe5 PF: > { %s14_s15 = sadd.s32 1, %s586_s15  }
  0xe6   : > { %p11_p4 = scmp.ge.s32.totalorder %s14_s15, 6  }
  0xe8   :  { %13 = sbr.rel (!%p11_p4) target bundleno = 1 (0x1), region = 66 }

</bundles_post_ra>
